<compile_context>
chip_gen: v7x
topology: tpu7x:2x2x1
jax: 0.10.0
libtpu: 0.0.40
codegen_flags: <defaults>
</compile_context>

<pallas_src>
import math

import jax
import jax.numpy as jnp
from jax.experimental import pallas as pl
from jax.experimental.pallas import tpu as pltpu


def make_sinusoidal_pos_emb(d_model: int, max_len: int) -> jnp.ndarray:
    """Deterministic buffer setup (glue, plain JAX). Mirrors the PyTorch init."""
    position = jnp.arange(max_len, dtype=jnp.float32)[:, None]          # [L, 1]
    div_term = jnp.exp(
        jnp.arange(0, d_model, 2, dtype=jnp.float32)
        * (-math.log(10000.0) / d_model)
    )                                                                   # [D/2]
    angles = position * div_term                                        # [L, D/2]
    pe = jnp.zeros((max_len, d_model), dtype=jnp.float32)
    pe = pe.at[:, 0::2].set(jnp.sin(angles))
    pe = pe.at[:, 1::2].set(jnp.cos(angles))
    return pe[None, :, :]                                               # [1, L, D]


def _add_pe_kernel(x_ref, pe_ref, o_ref):
    # Pure elementwise broadcast-add on a lane-dense flat tile.
    o_ref[...] = (x_ref[...] + pe_ref[...]).astype(o_ref.dtype)


# ~1 MiB (f32) per tile: 6 double-buffered tiles stay well under the v5e
# 16 MiB scoped-VMEM default (and far under v6e/v7x limits).
_MAX_TILE_ELEMS = 512 * 512  # multiple of 128


def sinusoidal_positional_encoding(x: jnp.ndarray,
                                    pos_emb: jnp.ndarray) -> jnp.ndarray:
    """x: [batch, seq_len, d_model]; pos_emb: [1, max_len, d_model]."""
    batch, seq_len, d_model = x.shape
    assert pos_emb.ndim == 3 and pos_emb.shape[0] == 1
    assert pos_emb.shape[2] == d_model
    assert seq_len <= pos_emb.shape[1], "seq_len must not exceed max_len"

    # Cast pe to the activation dtype (halves pe traffic / VMEM for bf16).
    pe = pos_emb[:, :seq_len, :].astype(x.dtype)

    # Lane-dense flatten: last dim is seq_len * d_model.
    flat = seq_len * d_model
    x3 = x.reshape(batch, 1, flat)
    pe3 = pe.reshape(1, 1, flat)

    if flat <= _MAX_TILE_ELEMS:
        tile = flat                 # full extent (always legal block shape)
        grid_t = 1
    else:
        tile = _MAX_TILE_ELEMS      # multiple of 128; edge block is masked
        grid_t = pl.cdiv(flat, tile)

    itemsize = jnp.dtype(x.dtype).itemsize
    cost = pl.CostEstimate(
        flops=batch * flat,
        transcendentals=0,
        bytes_accessed=(2 * batch * flat + flat) * itemsize,
    )

    out3 = pl.pallas_call(
        _add_pe_kernel,
        out_shape=jax.ShapeDtypeStruct((batch, 1, flat), x.dtype),
        grid_spec=pltpu.PrefetchScalarGridSpec(
            num_scalar_prefetch=0,
            # batch innermost -> pe block index constant across consecutive
            # steps, so pe is DMA'd once per flat tile, not once per batch.
            grid=(grid_t, batch),
            in_specs=[
                pl.BlockSpec((1, 1, tile), lambda t, b: (b, 0, t)),  # x
                pl.BlockSpec((1, 1, tile), lambda t, b: (0, 0, t)),  # pe
            ],
            out_specs=pl.BlockSpec((1, 1, tile), lambda t, b: (b, 0, t)),
        ),
        compiler_params=pltpu.CompilerParams(
            dimension_semantics=("parallel", "parallel")),
        # In-place add, like the PyTorch `x += pos_emb`.
        input_output_aliases={0: 0},
        cost_estimate=cost,
    )(x3, pe3)

    return out3.reshape(batch, seq_len, d_model)


if __name__ == "__main__":
    # Small shapes consistent with the module: batch=2, seq_len=max_len=8,
    # d_model=32.
    batch, max_len, d_model = 2, 8, 32

    key = jax.random.PRNGKey(0)
    x = jax.random.normal(key, (batch, max_len, d_model), dtype=jnp.float32)
    pos_emb = make_sinusoidal_pos_emb(d_model, max_len)

    # Compute references before the kernel (the kernel aliases/donates its
    # reshaped input buffer).
    ref_f32 = x + pos_emb

    out = sinusoidal_positional_encoding(x, pos_emb)
    out = jax.block_until_ready(out)
    assert out.shape == (batch, max_len, d_model)
    assert jnp.allclose(out, ref_f32, atol=1e-6), "f32 mismatch vs reference"

    # Also exercise the bf16 path (pe cast to activation dtype in wrapper).
    x_bf = x.astype(jnp.bfloat16)
    ref_bf = x_bf + pos_emb.astype(jnp.bfloat16)
    out_bf = jax.block_until_ready(
        sinusoidal_positional_encoding(x_bf, pos_emb))
    assert out_bf.dtype == jnp.bfloat16
    assert jnp.allclose(out_bf.astype(jnp.float32),
                        ref_bf.astype(jnp.float32), atol=1e-2), "bf16 mismatch"

    # TODO(synk): dropout is defined in __init__ but never used in forward;
    # intentionally not implemented.
    print("KERNEL_OK")
</pallas_src>

<mosaic_0001>
module attributes {stable_mosaic.version = 11 : i64} {
  func.func @_add_pe_kernel(%arg0: i32, %arg1: i32, %arg2: memref<1x1x256xf32, #tpu.memory_space<vmem>>, %arg3: memref<1x1x256xf32, #tpu.memory_space<vmem>>, %arg4: memref<1x1x256xf32, #tpu.memory_space<vmem>>) attributes {dimension_semantics = [#tpu.dimension_semantics<parallel>, #tpu.dimension_semantics<parallel>], iteration_bounds = array<i64: 1, 2>, scalar_prefetch = 0 : i64, scratch_operands = 0 : i64, tpu.core_type = #tpu.core_type<tc>, window_params = [{transform_indices = @transform_0, window_bounds = array<i64: 1, 1, 256>}, {transform_indices = @transform_1, window_bounds = array<i64: 1, 1, 256>}, {transform_indices = @transform_2, window_bounds = array<i64: 1, 1, 256>}]} {
    %c0 = arith.constant 0 : index
    %c0_0 = arith.constant 0 : index
    %c0_1 = arith.constant 0 : index
    %0 = vector.load %arg2[%c0, %c0_0, %c0_1] : memref<1x1x256xf32, #tpu.memory_space<vmem>>, vector<1x1x256xf32>
    %c0_2 = arith.constant 0 : index
    %c0_3 = arith.constant 0 : index
    %c0_4 = arith.constant 0 : index
    %1 = vector.load %arg3[%c0_2, %c0_3, %c0_4] : memref<1x1x256xf32, #tpu.memory_space<vmem>>, vector<1x1x256xf32>
    %2 = arith.addf %0, %1 : vector<1x1x256xf32>
    %c0_5 = arith.constant 0 : index
    %c0_6 = arith.constant 0 : index
    %c0_7 = arith.constant 0 : index
    %3 = vector.load %arg4[%c0_5, %c0_6, %c0_7] : memref<1x1x256xf32, #tpu.memory_space<vmem>>, vector<1x1x256xf32>
    tpu.vector_store %arg4[%c0_5, %c0_6, %c0_7], %2 {strides = array<i32>} : memref<1x1x256xf32, #tpu.memory_space<vmem>>, vector<1x1x256xf32>,
    return
  }
  func.func @transform_0(%arg0: i32, %arg1: i32) -> (i32, i32, i32) {
    %c0_i32 = arith.constant 0 : i32
    %c0_i32_0 = arith.constant 0 : i32
    return %arg1, %c0_i32, %arg0 : i32, i32, i32
  }
  func.func @transform_1(%arg0: i32, %arg1: i32) -> (i32, i32, i32) {
    %c0_i32 = arith.constant 0 : i32
    %c0_i32_0 = arith.constant 0 : i32
    %c0_i32_1 = arith.constant 0 : i32
    return %c0_i32, %c0_i32_0, %arg0 : i32, i32, i32
  }
  func.func @transform_2(%arg0: i32, %arg1: i32) -> (i32, i32, i32) {
    %c0_i32 = arith.constant 0 : i32
    %c0_i32_0 = arith.constant 0 : i32
    return %arg1, %c0_i32, %arg0 : i32, i32, i32
  }
}

</mosaic_0001>

<bundles_post_ra>
// kernel: tpu_custom_call.1
= control target key start
LH: loop header
LB: loop body
LE: loop exit
PB: predicated region body
PF: predicated region fallthrough
CT: control target
= control target key end

     0   :  { %7 = vsyncpa [#allocation3], 0  ;;  %s706_s0 = inlined_call_operand.hbm [shape: f32[2,1,256], index: 0, kind: input, shape index: {}, may-alias: {0,2}]   ;;  %s707_s1 = inlined_call_operand.vmem [shape: f32[1,1,256], index: 1, kind: input, shape index: {}]   ;;  %s708_s2 = inlined_call_operand.hbm [shape: f32[2,1,256], index: 2, kind: output, shape index: {}, may-alias: {0,2}]  }
   0x1   :  { %9 = vsyncpa [#allocation3 + $0x1], 0 }
   0x2   :  { %10 = vsyncpa [#allocation4], 0 }
   0x3   :  { %12 = vsyncpa [#allocation4 + $0x1], 0  ;;  %s531_s9 = smov 0   ;;  %s533_s10 = smov 0  }
   0x4   :  { %s535_s11 = smov 0   ;;  %s537_s12 = smov 0  }
   0x5   :  { %s539_s13 = smov 0   ;;  %s541_s14 = smov 0  }
   0x6 LB: > { %s320_s15 = sadd.s32 4294967295, %s512_s14   ;;  %s321_s16 = sadd.s32 4294967294, %s512_s14   ;;  %s512_s14 = sphi %s541_s14, %s18_s14   ;;  %s508_s13 = sphi %s539_s13, %s724_s13   ;;  %s504_s12 = sphi %s537_s12, %s723_s12   ;;  %s500_s11 = sphi %s535_s11, %s722_s11   ;;  %s496_s10 = sphi %s533_s10, %s721_s10   ;;  %s492_s9 = sphi %s531_s9, %s720_s9  }
   0x7   : > { %s27_s17 = sadd.s32 1, %s508_s13  ;;  %s39_s18 = sadd.s32 1, %s500_s11 }
   0x8   : > { %p28_p0 = scmp.ge.s32.totalorder %s27_s17, 2  ;;  %p46_p1 = scmp.ne.s32.totalorder %s500_s11, %s496_s10 }
   0x9   : > { %p47_p2 = scmp.eq.s32.totalorder %s512_s14, 0  ;;  %p52_p3 = scmp.ne.s32.totalorder %s496_s10, %s492_s9 }
   0xa   : > { %s726_s17 = smov (%p28_p0, %s27_s17), 0  ;;  %p53_p5 = scmp.eq.s32.totalorder %s320_s15, 0 }
   0xb   : > { %p572_p4 = por %p47_p2, %p46_p1  ;;  %s34_s20 = ssub.s32 %s508_s13, %s726_s17 }
   0xc   : > { %p104_p6 = scmp.eq.s32.totalorder %s320_s15, 1  ;;  %p37_p7 = scmp.eq.s32.totalorder %s34_s20, 0 }
   0xd   : > { %p578_p8 = por %p53_p5, %p52_p3  ;;  %p110_p10 = scmp.eq.s32.totalorder %s321_s16, 1 }
   0xe   : > { %p582_p9 = por %p104_p6, %p46_p1  ;;  %p350_p13 = scmp.lt.s32.totalorder %s512_s14, 2 }
   0xf   : > { %s587_s23 = scalar_select %p37_p7, %s500_s11, %s39_s18  }
  0x10   : > { %s712_s22 = scalar_select %p582_p9, 1, 0 }
  0x11   : > { %p589_p11 = por %p110_p10, %p52_p3  ;;  %s138_s25 = sand.u32 1, %s500_s11  }
  0x12   : > { %s325_s26 = sshll.u32 %s138_s25, 1  ;;  %s336_s27 = sshll.u32 %s508_s13, 5 }
  0x13   : > { %s713_s24 = scalar_select %p589_p11, 1, 0 }
  0x14   : > { %s600_s30 = scalar_lea.hbm %s706_s0, %s336_s27  ;;  %s142_s3 = scalar_lea.vmem [#allocation2], %s325_s26 }
  0x15   : > { %s152_s4 = sshll.u32 %s142_s3, 4  ;;  %p606_p0 = pnand %p350_p13, %p572_p4  ;;  %s602_s4 = int_to_ptr.vmem [resolvable:$true] %s152_s4 }
  0x16   : > { %s139_s6 = scalar_lea.sflag [#allocation3], %s138_s25  ;;  %s400_s7 = scalar_lea.hbm %s600_s30, 32 }
  0x17   : > { %p401_p3 = scmp.ne.s32.totalorder %s600_s30, %s400_s7  ;;  %p402_p5 = pneg %p606_p0 }
  0x18   : > { %s405_s16 = scalar_lea.hbm %s706_s0, 64  ;;  %p406_p4 = scmp.lt.u32.totalorder %s600_s30, %s706_s0 }
  0x19   : > { %p403_p6 = pnand %p402_p5, %p401_p3  ;;  %p407_p10 = scmp.lt.u32.totalorder %s405_s16, %s400_s7 }
  0x1a   : > { %p409_p12 = scmp.lt.u32.totalorder %s400_s7, %s600_s30 }
  0x1b   : > { %p404_p7 = pneg %p403_p6  ;;  %p408_p13 = por %p407_p10, %p406_p4 }
  0x1d   : > { %p410_p1 = por %p409_p12, %p408_p13 }
  0x1f   : > { %p411_p2 = pnand %p410_p1, %p404_p7 }
  0x21   : > { %414 = shalt.err (!%p411_p2)
}
  0x22   : > { %s415_s20 = scalar_lea.vmem %s602_s4, 32  ;;  %s514_s25 = smov [#allocation2]  }
  0x23   : > { %p416_p3 = scmp.ne.s32.totalorder %s602_s4, %s415_s20  ;;  %s420_s26 = sshll.u32 %s514_s25, 4  ;;  %s421_s26 = int_to_ptr.vmem [resolvable:$false] %s420_s26 }
  0x24   : > { %s422_s27 = scalar_lea.vmem %s421_s26, 64  ;;  %p423_p9 = scmp.lt.s32.totalorder %s602_s4, %s421_s26 }
  0x25   : > { %p418_p6 = pnand %p416_p3, %p402_p5  ;;  %p424_p4 = scmp.lt.s32.totalorder %s422_s27, %s415_s20 }
  0x27   : > { %p419_p11 = pneg %p418_p6  ;;  %p425_p10 = por %p424_p4, %p423_p9 }
  0x29   : > { %p426_p12 = pnand %p425_p10, %p419_p11 }
  0x2b   : > { %429 = shalt.err (!%p426_p12)
}
  0x2c   : > { %345 = dma.hbm_to_vmem [thread:$0]  (!%p606_p0), %s600_s30, 32, %s602_s4, %s139_s6  }
  0x2d   : > { %p715_p1 = scmp.lt.s32.totalorder %s512_s14, 3  ;;  %p716_p2 = scmp.ge.s32.totalorder %s512_s14, 1 }
  0x2f   : > { %p158_p5 = pnand %p716_p2, %p715_p1 }
  0x30   : > { %s642_s28 = sand.u32 (!%p158_p5), 1, %s496_s10  }
  0x31   : > { %161 = sbr.rel (%p158_p5) target bundleno = 83 (0x53), region = 28  ;;  %s329_s29 = sshll.u32 (!%p158_p5), %s642_s28, 1 }
  0x32   : > { %s164_s3 = scalar_lea.sflag (!%p158_p5), [#allocation3], %s642_s28  ;;  %s167_s7 = scalar_lea.vmem (!%p158_p5), [#allocation2], %s329_s29 }
  0x38   : > { %483 = dma.done.wait (%p578_p8), %s164_s3, 32  }
  0x39   : > { %485 = vsyncadd (%p578_p8), %s164_s3, 4294967264  ;;  %v202_v0 = vlaneseq  ;;  %s191_s30 = scalar_lea.vmem [#allocation5], %s329_s29  ;;  %s337_s5 = sshll.u32 %s504_s12, 5  ;;  %v199_v1 = vld [vmem:[%s167_s7] sm:$0x3] }
  0x3a   : > { %s224_s4 = sshll.u32 %s191_s30, 4  ;;  %v200_v2 = vld [vmem:[%s707_s1] sm:$0x3]  ;;  %s659_s21 = scalar_lea.hbm %s708_s2, %s337_s5  ;;  %s654_s4 = int_to_ptr.vmem [resolvable:$true] %s224_s4 }
  0x3b   : > { %vm204_vm0 = vcmp.lt.s32.totalorder %v202_v0, 256  ;;  %v201_v3 = vadd.f32 %v200_v2, %v199_v1  ;;  %s208_s18 = scalar_lea.sflag [#allocation4], %s642_s28  ;;  %s430_s12 = scalar_lea.vmem %s654_s4, 32 }
  0x3c   : > { %p431_p8 = scmp.ne.s32.totalorder %s654_s4, %s430_s12  ;;  %p717_p9 = scmp.ne.s32.totalorder %s712_s22, 0 }
  0x3d   : > { %206 = vst.msk [vmem:[%s191_s30] sm:$0x3] %vm204_vm0, %v201_v3  ;;  %s515_s19 = smov [#allocation5]  }
  0x3e   : > { %p432_p11 = pnand %p431_p8, %p717_p9  ;;  %s434_s20 = sshll.u32 %s515_s19, 4  ;;  %s435_s20 = int_to_ptr.vmem [resolvable:$false] %s434_s20 }
  0x3f   : > { %s436_s25 = scalar_lea.vmem %s435_s20, 64  ;;  %p437_p7 = scmp.lt.s32.totalorder %s654_s4, %s435_s20 }
  0x40   : > { %p433_p0 = pneg %p432_p11  ;;  %p438_p13 = scmp.lt.s32.totalorder %s436_s25, %s430_s12 }
  0x42   : > { %p439_p3 = por %p438_p13, %p437_p7 }
  0x44   : > { %p440_p6 = pnand %p439_p3, %p433_p0 }
  0x46   : > { %443 = shalt.err (!%p440_p6)
}
  0x47   : > { %s444_s26 = scalar_lea.hbm %s659_s21, 32  ;;  %s448_s29 = scalar_lea.hbm %s708_s2, 64 }
  0x48   : > { %p445_p4 = scmp.ne.s32.totalorder %s659_s21, %s444_s26  ;;  %p449_p1 = scmp.lt.u32.totalorder %s659_s21, %s708_s2 }
  0x49   : > { %p450_p2 = scmp.lt.u32.totalorder %s448_s29, %s444_s26  ;;  %p452_p8 = scmp.lt.u32.totalorder %s444_s26, %s659_s21 }
  0x4a   : > { %p446_p10 = pnand %p445_p4, %p717_p9 }
  0x4b   : > { %p451_p5 = por %p450_p2, %p449_p1 }
  0x4c   : > { %p447_p12 = pneg %p446_p10 }
  0x4d   : > { %p453_p11 = por %p452_p8, %p451_p5 }
  0x4f   : > { %p454_p0 = pnand %p453_p11, %p447_p12 }
  0x51   : > { %457 = shalt.err (!%p454_p0)
}
  0x52   : > { %340 = dma.vmem_to_hbm [thread:$0]  (%p717_p9), %s654_s4, 32, %s659_s21, %s208_s18  }
  0x53 PF: > { %s236_s30 = sand.u32 1, %s492_s9   ;;  %p718_p7 = scmp.ne.s32.totalorder %s713_s24, 0 }
  0x54   : > { %p719_p13 = scmp.ge.s32.totalorder %s512_s14, 2  ;;  %s237_s5 = scalar_lea.sflag [#allocation4], %s236_s30 }
  0x56   : > { %p347_p3 = pnand %p719_p13, %p718_p7 }
  0x58   : > { %487 = dma.done.wait (!%p347_p3), %s237_s5, 32  }
  0x59   : > { %489 = vsyncadd (!%p347_p3), %s237_s5, 4294967264  ;;  %s18_s14 = sadd.s32 1, %s512_s14   ;;  %s720_s9 = smov %s496_s10 }
  0x5a   : > { %p15_p6 = scmp.ge.s32.totalorder %s18_s14, 4   ;;  %s721_s10 = smov %s500_s11 }
  0x5b   : > { %s722_s11 = smov %s587_s23  ;;  %s723_s12 = smov %s508_s13 }
  0x5c   : > { %s724_s13 = smov %s726_s17  ;;  %17 = sbr.rel (!%p15_p6) target bundleno = 6 (0x6), region = 76 }
  0x63   :  { %242 = vsyncpa [#allocation3], 1 }
  0x64   :  { %244 = vsyncpa [#allocation3 + $0x1], 1 }
  0x65   :  { %245 = vsyncpa [#allocation4], 1 }
  0x66   :  { %247 = vsyncpa [#allocation4 + $0x1], 1 }

</bundles_post_ra>
